<compile_context>
chip_gen: v7x
topology: tpu7x:2x2x1
jax: 0.10.0
libtpu: 0.0.40
codegen_flags: <defaults>
</compile_context>

<pallas_src>
import jax
import jax.numpy as jnp
from jax.experimental import pallas as pl
from jax.experimental.pallas import tpu as pltpu


def predict_kernel(x_ref, w1_ref, b1_ref, w2_ref, b2_ref, o_ref):
    # x: (TB, E), w1: (E, H), b1: (1, H), w2: (1, H), b2: (1, 1), o: (1, TB)
    x = x_ref[...]
    h = jnp.dot(x, w1_ref[...], preferred_element_type=jnp.float32) + b1_ref[...]
    h = jnp.maximum(h, 0.0)                      # ReLU
    # Dropout(p=0) is identity — nothing to do.
    # Second linear has out_features=1: contract H with TB left on the lane
    # axis so the per-tile output is a lane-dense (1, TB) row.
    #   (1, H) x (TB, H)^T -> (1, TB)
    out_row = jax.lax.dot_general(
        w2_ref[...], h,
        dimension_numbers=(((1,), (1,)), ((), ())),
        preferred_element_type=jnp.float32,
    ) + b2_ref[...]
    o_ref[...] = out_row.astype(o_ref.dtype)


def predict_layer(x, w1, b1, w2, b2, *, tb=None, vmem_limit_bytes=48 << 20):
    """x: (B, E); w1: (E, H); b1: (H,); w2: (H, 1); b2: (1,) -> (B, 1)."""
    B, E = x.shape
    H = w1.shape[1]          # 8
    O = w2.shape[1]          # 1
    b1_2d = b1.reshape(1, H)
    b2_2d = b2.reshape(1, O)
    w2_row = w2.reshape(1, H)   # (H, 1) -> (1, H) broadcast row (O == 1)

    if tb is None:
        # ~8 MiB f32 x tile; 2x double buffers + lane-padded weights stay well
        # under the 48 MiB scoped limit on every TPU generation.
        bytes_budget = 8 << 20
        rows = bytes_budget // max(E * 4, 1)
        tb = max(128, (rows // 128) * 128)
    # Don't make the tile larger than the (128-padded) batch.
    b_pad = ((B + 127) // 128) * 128
    tb = min(tb, b_pad)
    tb = max(128, (tb // 128) * 128)

    num_tiles = pl.cdiv(B, tb)
    rows_padded = num_tiles * tb

    out_rows = pl.pallas_call(
        predict_kernel,
        # Lane-dense output: one (1, tb) row per batch tile.
        out_shape=jax.ShapeDtypeStruct((num_tiles, tb), x.dtype),
        grid_spec=pltpu.PrefetchScalarGridSpec(
            num_scalar_prefetch=0,
            grid=(num_tiles,),
            in_specs=[
                pl.BlockSpec((tb, E), lambda i: (i, 0)),   # x tile (pipelined)
                pl.BlockSpec((E, H), lambda i: (0, 0)),    # w1 (VMEM-resident)
                pl.BlockSpec((1, H), lambda i: (0, 0)),    # b1
                pl.BlockSpec((1, H), lambda i: (0, 0)),    # w2 as a row
                pl.BlockSpec((1, O), lambda i: (0, 0)),    # b2
                # (On v7x with very large E, pipeline_mode=pl.Buffered(1) on the
                #  constant-index weight specs would reclaim dead VMEM.)
            ],
            out_specs=pl.BlockSpec((1, tb), lambda i: (i, 0)),
        ),
        compiler_params=pltpu.CompilerParams(
            dimension_semantics=("parallel",),     # megacore split on v7x
            vmem_limit_bytes=vmem_limit_bytes,     # fits 2x 8 MiB tiles everywhere
        ),
    )(x, w1, b1_2d, w2_row, b2_2d)

    # (num_tiles, tb) rows are contiguous in batch order: free reshape, then
    # drop the padded tail and restore the (B, 1) column shape.
    return out_rows.reshape(rows_padded, 1)[:B]


if __name__ == "__main__":
    key = jax.random.PRNGKey(0)
    B, E, H, O = 8, 32, 8, 1

    kx, kw1, kb1, kw2, kb2 = jax.random.split(key, 5)
    x = jax.random.normal(kx, (B, E), dtype=jnp.float32)
    # Deterministic parameter init (uniform like PyTorch's default fan-in init).
    bound1 = 1.0 / (E ** 0.5)
    w1 = jax.random.uniform(kw1, (E, H), jnp.float32, -bound1, bound1)
    b1 = jax.random.uniform(kb1, (H,), jnp.float32, -bound1, bound1)
    bound2 = 1.0 / (H ** 0.5)
    w2 = jax.random.uniform(kw2, (H, O), jnp.float32, -bound2, bound2)
    b2 = jax.random.uniform(kb2, (O,), jnp.float32, -bound2, bound2)

    out = predict_layer(x, w1, b1, w2, b2)
    out = jax.block_until_ready(out)

    # Reference check in plain JAX (same math as the PyTorch module).
    ref = jnp.maximum(x @ w1 + b1, 0.0) @ w2 + b2
    assert out.shape == (B, O)
    assert jnp.allclose(out, ref, atol=1e-5, rtol=1e-5)

    print("KERNEL_OK")
</pallas_src>

<mosaic_0001>
module attributes {stable_mosaic.version = 11 : i64} {
  func.func @predict_kernel(%arg0: i32, %arg1: memref<128x32xf32, #tpu.memory_space<vmem>>, %arg2: memref<32x8xf32, #tpu.memory_space<vmem>>, %arg3: memref<1x8xf32, #tpu.memory_space<vmem>>, %arg4: memref<1x8xf32, #tpu.memory_space<vmem>>, %arg5: memref<1x1xf32, #tpu.memory_space<vmem>>, %arg6: memref<1x128xf32, #tpu.memory_space<vmem>>) attributes {dimension_semantics = [#tpu.dimension_semantics<parallel>], iteration_bounds = array<i64: 1>, scalar_prefetch = 0 : i64, scratch_operands = 0 : i64, tpu.core_type = #tpu.core_type<tc>, window_params = [{transform_indices = @transform_0, window_bounds = array<i64: 128, 32>}, {pipeline_mode = #tpu.pipeline_mode<synchronous>, transform_indices = @transform_1, window_bounds = array<i64: 32, 8>}, {pipeline_mode = #tpu.pipeline_mode<synchronous>, transform_indices = @transform_2, window_bounds = array<i64: 1, 8>}, {pipeline_mode = #tpu.pipeline_mode<synchronous>, transform_indices = @transform_3, window_bounds = array<i64: 1, 8>}, {pipeline_mode = #tpu.pipeline_mode<synchronous>, transform_indices = @transform_4, window_bounds = array<i64: 1, 1>}, {transform_indices = @transform_5, window_bounds = array<i64: 1, 128>}]} {
    %c0 = arith.constant 0 : index
    %c0_0 = arith.constant 0 : index
    %0 = vector.load %arg1[%c0, %c0_0] : memref<128x32xf32, #tpu.memory_space<vmem>>, vector<128x32xf32>
    %c0_1 = arith.constant 0 : index
    %c0_2 = arith.constant 0 : index
    %1 = vector.load %arg2[%c0_1, %c0_2] : memref<32x8xf32, #tpu.memory_space<vmem>>, vector<32x8xf32>
    %cst = arith.constant dense<0.000000e+00> : vector<128x8xf32>
    %2 = tpu.matmul %0, %1, %cst {dimension_numbers = #tpu.dot_dimension_numbers<[1], [0], [0], [1], [0, 0, 1, 1], [], []>} : vector<128x32xf32>, vector<32x8xf32>, vector<128x8xf32> -> vector<128x8xf32>
    %c0_3 = arith.constant 0 : index
    %c0_4 = arith.constant 0 : index
    %3 = vector.load %arg3[%c0_3, %c0_4] : memref<1x8xf32, #tpu.memory_space<vmem>>, vector<1x8xf32>
    %4 = vector.broadcast %3 : vector<1x8xf32> to vector<128x8xf32>
    %5 = arith.addf %2, %4 : vector<128x8xf32>
    %cst_5 = arith.constant 0.000000e+00 : f32
    %6 = vector.broadcast %cst_5 : f32 to vector<128x8xf32>
    %7 = arith.maximumf %5, %6 : vector<128x8xf32>
    %c0_6 = arith.constant 0 : index
    %c0_7 = arith.constant 0 : index
    %8 = vector.load %arg4[%c0_6, %c0_7] : memref<1x8xf32, #tpu.memory_space<vmem>>, vector<1x8xf32>
    %cst_8 = arith.constant dense<0.000000e+00> : vector<1x128xf32>
    %9 = tpu.matmul %8, %7, %cst_8 {dimension_numbers = #tpu.dot_dimension_numbers<[1], [1], [0], [0], [0, 0, 1, 0], [], []>} : vector<1x8xf32>, vector<128x8xf32>, vector<1x128xf32> -> vector<1x128xf32>
    %c0_9 = arith.constant 0 : index
    %c0_10 = arith.constant 0 : index
    %10 = vector.load %arg5[%c0_9, %c0_10] : memref<1x1xf32, #tpu.memory_space<vmem>>, vector<1x1xf32>
    %11 = vector.broadcast %10 : vector<1x1xf32> to vector<1x128xf32>
    %12 = arith.addf %9, %11 : vector<1x128xf32>
    %c0_11 = arith.constant 0 : index
    %c0_12 = arith.constant 0 : index
    %13 = vector.load %arg6[%c0_11, %c0_12] : memref<1x128xf32, #tpu.memory_space<vmem>>, vector<1x128xf32>
    tpu.vector_store %arg6[%c0_11, %c0_12], %12 {strides = array<i32>} : memref<1x128xf32, #tpu.memory_space<vmem>>, vector<1x128xf32>,
    return
  }
  func.func @transform_0(%arg0: i32) -> (i32, i32) {
    %c0_i32 = arith.constant 0 : i32
    %c0_i32_0 = arith.constant 0 : i32
    return %arg0, %c0_i32 : i32, i32
  }
  func.func @transform_1(%arg0: i32) -> (i32, i32) {
    %c0_i32 = arith.constant 0 : i32
    %c0_i32_0 = arith.constant 0 : i32
    %c0_i32_1 = arith.constant 0 : i32
    return %c0_i32, %c0_i32_0 : i32, i32
  }
  func.func @transform_2(%arg0: i32) -> (i32, i32) {
    %c0_i32 = arith.constant 0 : i32
    %c0_i32_0 = arith.constant 0 : i32
    %c0_i32_1 = arith.constant 0 : i32
    return %c0_i32, %c0_i32_0 : i32, i32
  }
  func.func @transform_3(%arg0: i32) -> (i32, i32) {
    %c0_i32 = arith.constant 0 : i32
    %c0_i32_0 = arith.constant 0 : i32
    %c0_i32_1 = arith.constant 0 : i32
    return %c0_i32, %c0_i32_0 : i32, i32
  }
  func.func @transform_4(%arg0: i32) -> (i32, i32) {
    %c0_i32 = arith.constant 0 : i32
    %c0_i32_0 = arith.constant 0 : i32
    %c0_i32_1 = arith.constant 0 : i32
    return %c0_i32, %c0_i32_0 : i32, i32
  }
  func.func @transform_5(%arg0: i32) -> (i32, i32) {
    %c0_i32 = arith.constant 0 : i32
    %c0_i32_0 = arith.constant 0 : i32
    return %arg0, %c0_i32 : i32, i32
  }
}

</mosaic_0001>

<bundles_post_ra>
// kernel: tpu_custom_call.1
= control target key start
LH: loop header
LB: loop body
LE: loop exit
PB: predicated region body
PF: predicated region fallthrough
CT: control target
= control target key end

     0   :  { %s779_s0 = inlined_call_operand.vmem [shape: f32[8,32], index: 0, kind: input, shape index: {}]   ;;  %s780_s1 = inlined_call_operand.vmem [shape: f32[32,8], index: 1, kind: input, shape index: {}]   ;;  %s781_s2 = inlined_call_operand.vmem [shape: f32[1,8], index: 2, kind: input, shape index: {}]   ;;  %s782_s3 = inlined_call_operand.vmem [shape: f32[1,8], index: 3, kind: input, shape index: {}]   ;;  %s783_s4 = inlined_call_operand.<no memory space> [shape: f32[1,1], index: 4, kind: input, shape index: {}]   ;;  %s784_s5 = inlined_call_operand.hbm [shape: f32[1,128], index: 5, kind: output, shape index: {}]  }
   0x1   :  { %v10_v0 = vstv %s783_s4 }
   0x2   :  { %11 = vst [vmem:[#allocation2] sm:$0x1] %v10_v0 }
   0x3   :  { %v39_v1 = vld [vmem:[%s780_s1] sm:$0xff]  ;;  %v40_v2 = vld [vmem:[%s780_s1 + $0x8] sm:$0xff]  ;;  %v41_v3 = vld [vmem:[%s780_s1 + $0x10] sm:$0xff]  ;;  %vm50_vm0 = vcmask 261120  }
   0x4   :  { %v546_v4 = vpack.c.bf16 %v40_v2, %v39_v1  ;;  %v42_v5 = vld [vmem:[%s780_s1 + $0x18] sm:$0xff]  ;;  %v23_v6 = vld [vmem:[%s779_s0] sm:$0xff] }
   0x5   :  { %v550_v7 = vpack.c.bf16 %v42_v5, %v41_v3  ;;  %487 = vmatprep.mubr.msk.f32.mxu0 %vm50_vm0, %v23_v6 }
   0x6   :  { %547 = vmatprep.subr.bf16.mxu0 %v546_v4 }
   0x7   :  { %549 = vmatpush3.bf16.msra.mxu0 %v546_v4 }
   0x8   :  { %551 = vmatprep.subr.bf16.mxu0 %v550_v7 }
   0x9   :  { %12 = vsyncpa [#allocation4], 0  ;;  %v24_v8 = vld [vmem:[%s779_s0 + $0x8] sm:$0xff]  ;;  %v25_v9 = vld [vmem:[%s779_s0 + $0x10] sm:$0xff]  ;;  %v616_v23 = vmov 0.0|0.0   ;;  %vm617_vm1 = vmmov 0  }
   0xa   :  { %v26_v10 = vld [vmem:[%s779_s0 + $0x18] sm:$0xff]  ;;  %v27_v11 = vld [vmem:[%s779_s0 + $0x20] sm:$0xff]  ;;  %v28_v12 = vld [vmem:[%s779_s0 + $0x28] sm:$0xff]  ;;  %554 = vmatprep.subr.bf16.mxu1 %v616_v23  ;;  %v618_v24 = vmov 0.0   ;;  %v619_v26 = vmov 0   ;;  %vm271_vm2 = vcmask 64512  }
   0xb   :  { %553 = vmatpush3.bf16.msra.mxu0 %v550_v7  ;;  %v29_v13 = vld [vmem:[%s779_s0 + $0x30] sm:$0xff]  ;;  %v30_v14 = vld [vmem:[%s779_s0 + $0x38] sm:$0xff]  ;;  %v31_v15 = vld [vmem:[%s779_s0 + $0x40] sm:$0xff]  ;;  %543 = vmatprep.mubr.msk.f32.mxu1 %vm617_vm1, %v618_v24  ;;  %s620_s8 = smov [#allocation3]  }
   0xc   :  { %v32_v16 = vld [vmem:[%s779_s0 + $0x48] sm:$0xff]  ;;  %v33_v17 = vld [vmem:[%s779_s0 + $0x50] sm:$0xff]  ;;  %v34_v18 = vld [vmem:[%s779_s0 + $0x58] sm:$0xff]  ;;  %591 = vset.pattern.permute.xlu0 %v619_v26  ;;  %s400_s9 = sshll.u32 %s620_s8, 4  ;;  %s401_s9 = int_to_ptr.vmem [resolvable:$true] %s400_s9 }
   0xd   :  { %v35_v19 = vld [vmem:[%s779_s0 + $0x60] sm:$0xff]  ;;  %v36_v20 = vld [vmem:[%s779_s0 + $0x68] sm:$0xff]  ;;  %v37_v21 = vld [vmem:[%s779_s0 + $0x70] sm:$0xff]  ;;  %s592_s10 = scalar_lea.vmem %s401_s9, 16  ;;  %s596_s11 = scalar_lea.vmem %s401_s9, 32 }
   0xe   :  { %488 = vmatmul.mubr.msk.f32.vlgmr.msra.gmra.mrb[0].mxu0 %vm50_vm0, %v24_v8  ;;  %v38_v22 = vld [vmem:[%s779_s0 + $0x78] sm:$0xff]  ;;  %v261_v25 = vld [vmem:[#allocation2] sm:$0x1]  ;;  %vm736_vm3 = vmpackc.low %vm271_vm2, %vm271_vm2  ;;  %p593_p0 = scmp.ne.s32.totalorder %s401_s9, %s592_s10  ;;  %p597_p1 = scmp.lt.s32.totalorder %s401_s9, %s401_s9 }
   0xf   :  { %490 = vmatprep.mubr.msk.f32.mxu0 %vm50_vm0, %v25_v9  ;;  %264 = vperm.xlu0 %591, %v261_v25   ;;  %v408_v27 = vld [vmem:[%s781_s2] ss:$0 sm:$0xff]  ;;  %p598_p2 = scmp.lt.s32.totalorder %s596_s11, %s592_s10 }
  0x11   :  { %p599_p3 = por %p598_p2, %p597_p1 }
  0x12   :  { %491 = vmatmul.mubr.msk.f32.gmra.mrb[2].mxu0 %vm50_vm0, %v26_v10 }
  0x13   :  { %493 = vmatprep.mubr.msk.f32.mxu0 %vm50_vm0, %v27_v11  ;;  %p600_p4 = pnand %p599_p3, %p593_p0 }
  0x16   :  { %494 = vmatmul.mubr.msk.f32.gmra.mrb[4].mxu0 %vm50_vm0, %v28_v12 }
  0x17   :  { %496 = vmatprep.mubr.msk.f32.mxu0 %vm50_vm0, %v29_v13 }
  0x1a   :  { %497 = vmatmul.mubr.msk.f32.gmra.mrb[6].mxu0 %vm50_vm0, %v30_v14 }
  0x1b   :  { %499 = vmatprep.mubr.msk.f32.mxu0 %vm50_vm0, %v31_v15 }
  0x1e   :  { %500 = vmatmul.mubr.msk.f32.gmra.mrb[8].mxu0 %vm50_vm0, %v32_v16 }
  0x1f   :  { %502 = vmatprep.mubr.msk.f32.mxu0 %vm50_vm0, %v33_v17 }
  0x22   :  { %503 = vmatmul.mubr.msk.f32.gmra.mrb[10].mxu0 %vm50_vm0, %v34_v18 }
  0x23   :  { %505 = vmatprep.mubr.msk.f32.mxu0 %vm50_vm0, %v35_v19 }
  0x26   :  { %506 = vmatmul.mubr.msk.f32.gmra.mrb[12].mxu0 %vm50_vm0, %v36_v20 }
  0x27   :  { %508 = vmatprep.mubr.msk.f32.mxu0 %vm50_vm0, %v37_v21  ;;  %v260_v21 = vld [vmem:[%s782_s3] sm:$0x1] }
  0x2a   :  { %509 = vmatmul.mubr.msk.f32.gmra.mrb[14].mxu0 %vm50_vm0, %v38_v22  ;;  %v267_v22 = vlaneseq }
  0x2c   :  { %v268_v24 = vshrl.u32 %v267_v22, 7 }
  0x2e   :  { %v269_v25 = vsub.s32 0, %v268_v24 }
  0x8e   :  { %v265_v26 = vpop.permute.xlu0 %264 }
  0xe1   :  { %v489_v28 = vpop.f32.mrb[0].mxu0 }
  0xe2   :  { %v171_v29 = vadd.f32 %v489_v28, %v408_v27  ;;  %v165_v30 = vpop.f32.mrb[1].mxu0 }
  0xe3   :  { %v166_v31 = vadd.f32 %v408_v27, %v165_v30 }
  0xe4   :  { %v245_v32 = vmax.f32 %v171_v29, 0.0 }
  0xe5   :  { %v244_v33 = vmax.f32 %v166_v31, 0.0  ;;  %v492_v34 = vpop.f32.mrb[2].mxu0 }
  0xe6   :  { %v181_v35 = vadd.f32 %v492_v34, %v408_v27  ;;  %v175_v36 = vpop.f32.mrb[3].mxu0 }
  0xe7   :  { %v555_v38 = vpack.c.bf16 %v245_v32, %v244_v33  ;;  %v176_v39 = vadd.f32 %v408_v27, %v175_v36 }
  0xe8   :  { %v247_v40 = vmax.f32 %v181_v35, 0.0 }
  0xe9   :  { %v246_v41 = vmax.f32 %v176_v39, 0.0  ;;  %557 = vmatpush3.bf16.xpose.msk.msra.mxu1 %vm736_vm3, %v555_v38  ;;  %v495_v42 = vpop.f32.mrb[4].mxu0 }
  0xea   :  { %v191_v43 = vadd.f32 %v495_v42, %v408_v27  ;;  %558 = vmatprep.subr.bf16.mxu1 %v616_v23  ;;  %v185_v44 = vpop.f32.mrb[5].mxu0 }
  0xeb   :  { %v559_v45 = vpack.c.bf16 %v247_v40, %v246_v41  ;;  %v186_v46 = vadd.f32 %v408_v27, %v185_v44 }
  0xec   :  { %v249_v47 = vmax.f32 %v191_v43, 0.0 }
  0xed   :  { %v248_v48 = vmax.f32 %v186_v46, 0.0  ;;  %v498_v49 = vpop.f32.mrb[6].mxu0 }
  0xee   :  { %v201_v50 = vadd.f32 %v498_v49, %v408_v27  ;;  %v195_v51 = vpop.f32.mrb[7].mxu0 }
  0xef   :  { %v563_v52 = vpack.c.bf16 %v249_v47, %v248_v48  ;;  %v196_v53 = vadd.f32 %v408_v27, %v195_v51 }
  0xf0   :  { %v251_v54 = vmax.f32 %v201_v50, 0.0 }
  0xf1   :  { %561 = vmatpush3.bf16.xpose.msk.msra.mxu1 %vm736_vm3, %v559_v45  ;;  %v250_v55 = vmax.f32 %v196_v53, 0.0  ;;  %v501_v56 = vpop.f32.mrb[8].mxu0 }
  0xf2   :  { %562 = vmatprep.subr.bf16.mxu1 %v616_v23  ;;  %v211_v57 = vadd.f32 %v501_v56, %v408_v27  ;;  %v205_v58 = vpop.f32.mrb[9].mxu0 }
  0xf3   :  { %v567_v59 = vpack.c.bf16 %v251_v54, %v250_v55  ;;  %v206_v60 = vadd.f32 %v408_v27, %v205_v58 }
  0xf4   :  { %v253_v61 = vmax.f32 %v211_v57, 0.0 }
  0xf5   :  { %v252_v62 = vmax.f32 %v206_v60, 0.0  ;;  %v504_v63 = vpop.f32.mrb[10].mxu0 }
  0xf6   :  { %v221_v0 = vadd.f32 %v504_v63, %v408_v27  ;;  %v215_v1 = vpop.f32.mrb[11].mxu0 }
  0xf7   :  { %v571_v2 = vpack.c.bf16 %v253_v61, %v252_v62  ;;  %v216_v3 = vadd.f32 %v408_v27, %v215_v1 }
  0xf8   :  { %v255_v4 = vmax.f32 %v221_v0, 0.0 }
  0xf9   :  { %565 = vmatpush3.bf16.xpose.msk.msra.mxu1 %vm736_vm3, %v563_v52  ;;  %v254_v5 = vmax.f32 %v216_v3, 0.0  ;;  %v507_v6 = vpop.f32.mrb[12].mxu0 }
  0xfa   :  { %566 = vmatprep.subr.bf16.mxu1 %v616_v23  ;;  %v231_v7 = vadd.f32 %v507_v6, %v408_v27  ;;  %v225_v8 = vpop.f32.mrb[13].mxu0 }
  0xfb   :  { %v575_v9 = vpack.c.bf16 %v255_v4, %v254_v5  ;;  %v226_v10 = vadd.f32 %v408_v27, %v225_v8 }
  0xfc   :  { %v257_v11 = vmax.f32 %v231_v7, 0.0 }
  0xfd   :  { %v256_v12 = vmax.f32 %v226_v10, 0.0  ;;  %v510_v13 = vpop.f32.mrb[14].mxu0 }
  0xfe   :  { %v241_v14 = vadd.f32 %v510_v13, %v408_v27  ;;  %v235_v15 = vpop.f32.mrb[15].mxu0 }
  0xff   :  { %v579_v16 = vpack.c.bf16 %v257_v11, %v256_v12  ;;  %v236_v17 = vadd.f32 %v408_v27, %v235_v15  ;;  %v270_v27 = vrot.slane %v265_v26, %v269_v25 }
 0x100   :  { %v259_v18 = vmax.f32 %v241_v14, 0.0 }
 0x101   :  { %569 = vmatpush3.bf16.xpose.msk.msra.mxu1 %vm736_vm3, %v567_v59  ;;  %v258_v19 = vmax.f32 %v236_v17, 0.0 }
 0x102   :  { %570 = vmatprep.subr.bf16.mxu1 %v616_v23 }
 0x103   :  { %v583_v20 = vpack.c.bf16 %v259_v18, %v258_v19 }
 0x109   :  { %573 = vmatpush3.bf16.xpose.msk.msra.mxu1 %vm736_vm3, %v571_v2 }
 0x10a   :  { %574 = vmatprep.subr.bf16.mxu1 %v616_v23 }
 0x111   :  { %577 = vmatpush3.bf16.xpose.msk.msra.mxu1 %vm736_vm3, %v575_v9 }
 0x112   :  { %578 = vmatprep.subr.bf16.mxu1 %v616_v23 }
 0x119   :  { %581 = vmatpush3.bf16.xpose.msk.msra.mxu1 %vm736_vm3, %v579_v16 }
 0x11a   :  { %582 = vmatprep.subr.bf16.mxu1 %v616_v23 }
 0x121   :  { %585 = vmatpush3.bf16.xpose.msk.msra.mxu1 %vm736_vm3, %v583_v20 }
 0x128   :  { %544 = vmatmul.mubr.msk.f32.vlgmr.msra.gmra.mrb[0].mxu1 %vm271_vm2, %v260_v21 }
 0x1fb   :  { %v389_v28 = vpop.f32.mrb[0].mxu1 }
 0x1fc   :  { %v390_v29 = vadd.f32 %v389_v28, %v270_v27  ;;  %v545_v30 = vpop.f32.mrb[1].mxu1 }
 0x1fe   :  { %393 = vst [vmem:[#allocation3] sm:$0x1] %v390_v29 }
 0x1ff   :  { %603 = shalt.err (!%p600_p4)
}
 0x200   :  { %s604_s13 = scalar_lea.hbm %s784_s5, 16 }
 0x201   :  { %p605_p5 = scmp.ne.s32.totalorder %s784_s5, %s604_s13  ;;  %p608_p6 = scmp.lt.u32.totalorder %s604_s13, %s784_s5 }
 0x203   :  { %p610_p7 = pnand %p608_p6, %p605_p5 }
 0x205   :  { %613 = shalt.err (!%p610_p7)
}
 0x206   :  { %403 = dma.vmem_to_hbm [thread:$0]  %s401_s9, 16, %s784_s5, [#allocation4]  }
 0x207   :  { %614 = dma.done.wait [#allocation4], 16  }
 0x208   :  { %615 = vsyncadd [#allocation4], 4294967280 }
 0x209   :  { %407 = vsyncpa [#allocation4], 1 }

</bundles_post_ra>
